<compile_context>
chip_gen: v7x
topology: tpu7x:2x2x1
jax: 0.10.0
libtpu: 0.0.40
codegen_flags: <defaults>
</compile_context>

<pallas_src>
import jax
import jax.numpy as jnp
from jax.experimental import pallas as pl
from jax.experimental.pallas import tpu as pltpu


def _round_up(n, m):
    return ((n + m - 1) // m) * m


def _distlinear_kernel(x_ref, v_ref, s_ref, o_ref, xn_ref):
    """One (B-tile i, O-tile j) grid step.

    x_ref : [tb, D]  input rows (full feature dim -> single-pass norm)
    v_ref : [to, D]  raw (un-normalized) weight rows
    s_ref : [1, to]  column scale = scale_factor * g / ||v||_row (precomputed)
    o_ref : [tb, to] output tile
    xn_ref: [tb, D]  f32 scratch holding normalized x, reused over all j
    """
    j = pl.program_id(1)

    # Normalize the x tile once per batch-tile (j is the inner, serial axis).
    @pl.when(j == 0)
    def _():
        x = x_ref[...].astype(jnp.float32)
        nrm = jnp.sqrt(jnp.sum(x * x, axis=1, keepdims=True))   # [tb, 1]
        inv = pl.reciprocal(nrm + 1e-5, approx=True)            # EUP slot
        xn_ref[...] = x * inv

    # Transpose-free contraction over the feature axis on the MXU.
    xn = xn_ref[...].astype(v_ref.dtype)   # bf16 weights -> bf16 MXU operands
    raw = jax.lax.dot_general(
        xn, v_ref[...],
        dimension_numbers=(((1,), (1,)), ((), ())),
        preferred_element_type=jnp.float32)                     # [tb, to]

    # Fold WeightNorm scaling + scale_factor onto the output columns.
    o_ref[...] = (raw * s_ref[...]).astype(o_ref.dtype)


def _choose_tiles(b_pad, o_pad, d, budget_bytes):
    """Pick (tb, to) that fit the VMEM budget (double-buffered inputs + scratch)."""
    tb = min(b_pad, 256)
    to = min(o_pad, 512)

    def vmem_bytes(tb_, to_):
        # 2x-buffered x/v/scale tiles + 2x-buffered out + f32 x_n scratch (f32 worst case)
        return 4 * (2 * (tb_ * d + to_ * d + to_) + 2 * tb_ * to_ + tb_ * d)

    while vmem_bytes(tb, to) > budget_bytes and to > 128:
        to //= 2
    while vmem_bytes(tb, to) > budget_bytes and tb > 8:
        tb //= 2
    return tb, to


def dist_linear(x, v, g, outdim):
    """Pallas forward of distLinear. x: [B, indim], v: [outdim, indim], g: [outdim, 1]."""
    B, D = x.shape
    O = outdim
    assert v.shape == (O, D)
    scale = 2.0 if O <= 200 else 10.0

    # Tiny per-row scale, computed once in XLA and applied to output columns
    # so the kernel never touches g / ||v|| on the hot path.
    v32 = v.astype(jnp.float32)
    v_norm = jnp.sqrt(jnp.sum(v32 * v32, axis=1))                     # [O]
    col_scale = scale * g.reshape(-1).astype(jnp.float32) / v_norm    # [O]

    # Pad to TPU-friendly shapes: sublane (8) on B, lane-dense 128-multiples on O.
    b_pad = _round_up(B, 8)
    o_pad = _round_up(O, 128)
    tb, to = _choose_tiles(b_pad, o_pad, D, budget_bytes=40 * 1024 * 1024)
    b_pad = _round_up(b_pad, tb)
    o_pad = _round_up(o_pad, to)

    x_p = jnp.zeros((b_pad, D), x.dtype).at[:B].set(x)
    v_p = jnp.zeros((o_pad, D), v.dtype).at[:O].set(v)
    s_p = jnp.zeros((1, o_pad), jnp.float32).at[0, :O].set(col_scale)

    grid = (b_pad // tb, o_pad // to)

    out = pl.pallas_call(
        _distlinear_kernel,
        out_shape=jax.ShapeDtypeStruct((b_pad, o_pad), x.dtype),
        grid=grid,
        in_specs=[
            pl.BlockSpec((tb, D), lambda i, j: (i, 0)),    # x tile
            pl.BlockSpec((to, D), lambda i, j: (j, 0)),    # weight rows
            pl.BlockSpec((1, to), lambda i, j: (0, j)),    # column scale
        ],
        out_specs=pl.BlockSpec((tb, to), lambda i, j: (i, j)),
        scratch_shapes=[pltpu.VMEM((tb, D), jnp.float32)],
        compiler_params=pltpu.CompilerParams(
            # O-axis must stay serial (x_n scratch is reused across O-tiles);
            # batch axis is parallel so v7x's two TensorCores split the work.
            dimension_semantics=("parallel", "arbitrary"),
            # Raise the scoped-VMEM cap above the 16/32 MiB defaults, but stay
            # conservative for v7x's 64 MiB physical VMEM.
            vmem_limit_bytes=48 * 1024 * 1024,
        ),
    )(x_p, v_p, s_p)

    return out[:B, :O]


def init_params(key, indim, outdim):
    """Deterministic init mimicking nn.Linear (kaiming-uniform) + WeightNorm."""
    bound = 1.0 / jnp.sqrt(jnp.float32(indim))
    v = jax.random.uniform(key, (outdim, indim), jnp.float32, -bound, bound)
    # WeightNorm init: g = ||original weight||_2 per row -> W_eff == original weight.
    g = jnp.sqrt(jnp.sum(v * v, axis=1, keepdims=True))  # [outdim, 1]
    return v, g


def reference(x, v, g, outdim):
    scale = 2.0 if outdim <= 200 else 10.0
    x_norm = jnp.linalg.norm(x, axis=1, keepdims=True)
    x_n = x / (x_norm + 1e-5)
    v_norm = jnp.linalg.norm(v, axis=1, keepdims=True)
    w = v * (g / v_norm)
    return scale * (x_n @ w.T)


if __name__ == "__main__":
    key = jax.random.PRNGKey(0)
    k_x, k_w = jax.random.split(key)

    batch, indim, outdim = 8, 32, 16
    x = jax.random.normal(k_x, (batch, indim), jnp.float32)
    v, g = init_params(k_w, indim, outdim)

    out = dist_linear(x, v, g, outdim)
    out = jax.block_until_ready(out)

    ref = reference(x, v, g, outdim)
    assert out.shape == (batch, outdim)
    # Tolerance accounts for the EUP approximate reciprocal (~2^-12 rel error).
    assert jnp.allclose(out, ref, atol=2e-3, rtol=2e-3), "mismatch vs reference"

    print("KERNEL_OK")
</pallas_src>

<mosaic_0001>
module attributes {stable_mosaic.version = 11 : i64} {
  func.func @_distlinear_kernel(%arg0: i32, %arg1: i32, %arg2: memref<8x32xf32, #tpu.memory_space<vmem>>, %arg3: memref<128x32xf32, #tpu.memory_space<vmem>>, %arg4: memref<1x128xf32, #tpu.memory_space<vmem>>, %arg5: memref<8x128xf32, #tpu.memory_space<vmem>>, %arg6: memref<8x32xf32, #tpu.memory_space<vmem>>) attributes {dimension_semantics = [#tpu.dimension_semantics<parallel>, #tpu.dimension_semantics<arbitrary>], iteration_bounds = array<i64: 1, 1>, scalar_prefetch = 0 : i64, scratch_operands = 1 : i64, tpu.core_type = #tpu.core_type<tc>, window_params = [{transform_indices = @transform_0, window_bounds = array<i64: 8, 32>}, {transform_indices = @transform_1, window_bounds = array<i64: 128, 32>}, {transform_indices = @transform_2, window_bounds = array<i64: 1, 128>}, {transform_indices = @transform_3, window_bounds = array<i64: 8, 128>}]} {
    %c0_i32 = arith.constant 0 : i32
    %0 = arith.cmpi eq, %arg1, %c0_i32 : i32
    %1 = arith.extui %0 : i1 to i32
    %c0_i32_0 = arith.constant 0 : i32
    %2 = arith.cmpi ne, %1, %c0_i32_0 : i32
    scf.if %2 {
      %c0_8 = arith.constant 0 : index
      %c0_9 = arith.constant 0 : index
      %10 = vector.load %arg2[%c0_8, %c0_9] : memref<8x32xf32, #tpu.memory_space<vmem>>, vector<8x32xf32>
      %11 = arith.mulf %10, %10 : vector<8x32xf32>
      %cst_10 = arith.constant dense<0.000000e+00> : vector<8xf32>
      %12 = vector.multi_reduction <add>, %11, %cst_10 [1] : vector<8x32xf32> to vector<8xf32>
      %13 = vector.shape_cast %12 : vector<8xf32> to vector<8x1xf32>
      %14 = math.sqrt %13 : vector<8x1xf32>
      %cst_11 = arith.constant 9.99999974E-6 : f32
      %15 = vector.broadcast %cst_11 : f32 to vector<8x1xf32>
      %16 = arith.addf %14, %15 : vector<8x1xf32>
      %17 = tpu.reciprocal %16 {approx = true} : vector<8x1xf32> -> vector<8x1xf32>
      %18 = vector.broadcast %17 : vector<8x1xf32> to vector<8x32xf32>
      %19 = arith.mulf %10, %18 : vector<8x32xf32>
      %c0_12 = arith.constant 0 : index
      %c0_13 = arith.constant 0 : index
      %20 = vector.load %arg6[%c0_12, %c0_13] : memref<8x32xf32, #tpu.memory_space<vmem>>, vector<8x32xf32>
      tpu.vector_store %arg6[%c0_12, %c0_13], %19 {strides = array<i32>} : memref<8x32xf32, #tpu.memory_space<vmem>>, vector<8x32xf32>,
    } else {
    }
    %c0 = arith.constant 0 : index
    %c0_1 = arith.constant 0 : index
    %3 = vector.load %arg6[%c0, %c0_1] : memref<8x32xf32, #tpu.memory_space<vmem>>, vector<8x32xf32>
    %c0_2 = arith.constant 0 : index
    %c0_3 = arith.constant 0 : index
    %4 = vector.load %arg3[%c0_2, %c0_3] : memref<128x32xf32, #tpu.memory_space<vmem>>, vector<128x32xf32>
    %cst = arith.constant dense<0.000000e+00> : vector<8x128xf32>
    %5 = tpu.matmul %3, %4, %cst {dimension_numbers = #tpu.dot_dimension_numbers<[1], [1], [0], [0], [0, 0, 1, 0], [], []>} : vector<8x32xf32>, vector<128x32xf32>, vector<8x128xf32> -> vector<8x128xf32>
    %c0_4 = arith.constant 0 : index
    %c0_5 = arith.constant 0 : index
    %6 = vector.load %arg4[%c0_4, %c0_5] : memref<1x128xf32, #tpu.memory_space<vmem>>, vector<1x128xf32>
    %7 = vector.broadcast %6 : vector<1x128xf32> to vector<8x128xf32>
    %8 = arith.mulf %5, %7 : vector<8x128xf32>
    %c0_6 = arith.constant 0 : index
    %c0_7 = arith.constant 0 : index
    %9 = vector.load %arg5[%c0_6, %c0_7] : memref<8x128xf32, #tpu.memory_space<vmem>>, vector<8x128xf32>
    tpu.vector_store %arg5[%c0_6, %c0_7], %8 {strides = array<i32>} : memref<8x128xf32, #tpu.memory_space<vmem>>, vector<8x128xf32>,
    return
  }
  func.func @transform_0(%arg0: i32, %arg1: i32) -> (i32, i32) {
    %c0_i32 = arith.constant 0 : i32
    %c0_i32_0 = arith.constant 0 : i32
    return %arg0, %c0_i32 : i32, i32
  }
  func.func @transform_1(%arg0: i32, %arg1: i32) -> (i32, i32) {
    %c0_i32 = arith.constant 0 : i32
    %c0_i32_0 = arith.constant 0 : i32
    return %arg1, %c0_i32 : i32, i32
  }
  func.func @transform_2(%arg0: i32, %arg1: i32) -> (i32, i32) {
    %c0_i32 = arith.constant 0 : i32
    %c0_i32_0 = arith.constant 0 : i32
    return %c0_i32, %arg1 : i32, i32
  }
  func.func @transform_3(%arg0: i32, %arg1: i32) -> (i32, i32) {
    %c0_i32 = arith.constant 0 : i32
    return %arg0, %arg1 : i32, i32
  }
}

</mosaic_0001>

<bundles_post_ra>
// kernel: tpu_custom_call.1
= control target key start
LH: loop header
LB: loop body
LE: loop exit
PB: predicated region body
PF: predicated region fallthrough
CT: control target
= control target key end

     0   :  { %vm21_vm0 = vcmask 261120   ;;  %v332_v5 = vmov 0.0|0.0   ;;  %s452_s0 = inlined_call_operand.vmem [shape: f32[8,32], index: 0, kind: input, shape index: {}]   ;;  %s453_s1 = inlined_call_operand.vmem [shape: f32[128,32], index: 1, kind: input, shape index: {}]   ;;  %s454_s2 = inlined_call_operand.vmem [shape: f32[1,128], index: 2, kind: input, shape index: {}]   ;;  %s455_s3 = inlined_call_operand.hbm [shape: f32[8,128], index: 3, kind: output, shape index: {}]  }
   0x1   :  { %v359_v0 = vld [vmem:[%s452_s0] sm:$0xff]  ;;  %v38_v2 = vld [vmem:[%s453_s1 + $0x8] sm:$0xff]  ;;  %vm371_vm1 = vmpackc.low %vm21_vm0, %vm21_vm0  ;;  %268 = vmatprep.subr.bf16.mxu0 %v332_v5 }
   0x2   :  { %v37_v1 = vld [vmem:[%s453_s1] sm:$0xff]  ;;  %v20_v3 = vmul.f32 %v359_v0, %v359_v0 }
   0x3   :  { %v269_v6 = vpack.c.bf16 %v38_v2, %v37_v1 }
   0x4   :  { %8 = vsyncpa [#allocation4], 0  ;;  %v22_v7 = vsel %vm21_vm0, %v20_v3, 0.0  ;;  %v39_v8 = vld [vmem:[%s453_s1 + $0x10] sm:$0xff]  ;;  %v40_v9 = vld [vmem:[%s453_s1 + $0x18] sm:$0xff]  ;;  %vm333_vm2 = vmmov 0  }
   0x5   :  { %271 = vmatpush3.bf16.xpose.msk.msra.mxu0 %vm371_vm1, %v269_v6  ;;  %23 = vadd.xlane.f32.xlu0 %v22_v7  ;;  %v273_v10 = vpack.c.bf16 %v40_v9, %v39_v8  ;;  %v41_v11 = vld [vmem:[%s453_s1 + $0x20] sm:$0xff]  ;;  %v42_v12 = vld [vmem:[%s453_s1 + $0x28] sm:$0xff]  ;;  %v43_v14 = vld [vmem:[%s453_s1 + $0x30] sm:$0xff]  ;;  %v334_v26 = vmov 0.0   ;;  %s335_s18 = smov [#allocation3]  }
   0x6   :  { %272 = vmatprep.subr.bf16.mxu0 %v332_v5  ;;  %v277_v13 = vpack.c.bf16 %v42_v12, %v41_v11  ;;  %v44_v15 = vld [vmem:[%s453_s1 + $0x38] sm:$0xff]  ;;  %v45_v17 = vld [vmem:[%s453_s1 + $0x40] sm:$0xff]  ;;  %v46_v18 = vld [vmem:[%s453_s1 + $0x48] sm:$0xff]  ;;  %265 = vmatprep.mubr.msk.f32.mxu0 %vm333_vm2, %v334_v26  ;;  %s190_s19 = sshll.u32 %s335_s18, 4  ;;  %s191_s19 = int_to_ptr.vmem [resolvable:$true] %s190_s19 }
   0x7   :  { %v281_v16 = vpack.c.bf16 %v44_v15, %v43_v14  ;;  %v285_v19 = vpack.c.bf16 %v46_v18, %v45_v17  ;;  %v47_v20 = vld [vmem:[%s453_s1 + $0x50] sm:$0xff]  ;;  %v48_v21 = vld [vmem:[%s453_s1 + $0x58] sm:$0xff]  ;;  %v49_v23 = vld [vmem:[%s453_s1 + $0x60] sm:$0xff]  ;;  %s308_s20 = scalar_lea.vmem %s191_s19, 128  ;;  %p313_p1 = scmp.lt.s32.totalorder %s191_s19, %s191_s19 }
   0x8   :  { %v289_v22 = vpack.c.bf16 %v48_v21, %v47_v20  ;;  %v50_v24 = vld [vmem:[%s453_s1 + $0x68] sm:$0xff]  ;;  %v51_v27 = vld [vmem:[%s453_s1 + $0x70] sm:$0xff]  ;;  %v52_v28 = vld [vmem:[%s453_s1 + $0x78] sm:$0xff]  ;;  %p309_p0 = scmp.ne.s32.totalorder %s191_s19, %s308_s20  ;;  %p314_p2 = scmp.lt.s32.totalorder %s308_s20, %s308_s20 }
   0x9   :  { %v293_v25 = vpack.c.bf16 %v50_v24, %v49_v23  ;;  %v297_v29 = vpack.c.bf16 %v52_v28, %v51_v27  ;;  %v215_v40 = vld [vmem:[%s454_s2] ss:$0 sm:$0xff] }
   0xa   :  { %p315_p3 = por %p314_p2, %p313_p1 }
   0xc   :  { %p316_p4 = pnand %p315_p3, %p309_p0 }
   0xd   :  { %275 = vmatpush3.bf16.xpose.msk.msra.mxu0 %vm371_vm1, %v273_v10 }
   0xe   :  { %276 = vmatprep.subr.bf16.mxu0 %v332_v5 }
  0x15   :  { %279 = vmatpush3.bf16.xpose.msk.msra.mxu0 %vm371_vm1, %v277_v13 }
  0x16   :  { %280 = vmatprep.subr.bf16.mxu0 %v332_v5 }
  0x1d   :  { %283 = vmatpush3.bf16.xpose.msk.msra.mxu0 %vm371_vm1, %v281_v16 }
  0x1e   :  { %284 = vmatprep.subr.bf16.mxu0 %v332_v5 }
  0x25   :  { %287 = vmatpush3.bf16.xpose.msk.msra.mxu0 %vm371_vm1, %v285_v19 }
  0x26   :  { %288 = vmatprep.subr.bf16.mxu0 %v332_v5 }
  0x2d   :  { %291 = vmatpush3.bf16.xpose.msk.msra.mxu0 %vm371_vm1, %v289_v22 }
  0x2e   :  { %292 = vmatprep.subr.bf16.mxu0 %v332_v5 }
  0x35   :  { %295 = vmatpush3.bf16.xpose.msk.msra.mxu0 %vm371_vm1, %v293_v25 }
  0x36   :  { %296 = vmatprep.subr.bf16.mxu0 %v332_v5 }
  0x3d   :  { %299 = vmatpush3.bf16.xpose.msk.msra.mxu0 %vm371_vm1, %v297_v29 }
  0x92   :  { %v24_v30 = vpop.xlane.xlu0 %23 }
  0x93   :  { %304 = vrsqrt.f32 %v24_v30  ;;  %vm27_vm3 = vcmp.eq.f32.partialorder %v24_v30, inf  ;;  %v30_v33 = vand.u32 2147483648, %v24_v30  ;;  %vm29_vm4 = vcmp.eq.f32.partialorder %v24_v30, 0.0 }
  0x9d   :  { %v305_v31 = vpop.eup %304 }
  0x9e   :  { %v26_v32 = vmul.f32 %v305_v31, %v24_v30 }
  0xa0   :  { %v28_v34 = vsel %vm27_vm3, %v24_v30, %v26_v32 }
  0xa1   :  { %v31_v35 = vsel %vm29_vm4, %v30_v33, %v28_v34 }
  0xa2   :  { %v32_v36 = vadd.f32 1e-05, %v31_v35 }
  0xa4   :  { %306 = vrcp.f32 %v32_v36 }
  0xae   :  { %v307_v37 = vpop.eup %306 }
  0xaf   :  { %v34_v38 = vmul.f32 %v307_v37, %v359_v0 }
  0xb1   :  { %35 = vst.msk [vmem:[#allocation2] sm:$0xff] %vm21_vm0, %v34_v38 }
  0xb8   :  { %v36_v39 = vld [vmem:[#allocation2] sm:$0xff] }
  0xb9   :  { %266 = vmatmul.mubr.msk.f32.vlgmr.msra.gmra.mrb[0].mxu0 %vm21_vm0, %v36_v39 }
 0x18c   :  { %v171_v41 = vpop.f32.mrb[0].mxu0 }
 0x18d   :  { %v182_v42 = vmul.f32 %v215_v40, %v171_v41  ;;  %v267_v43 = vpop.f32.mrb[1].mxu0 }
 0x18f   :  { %183 = vst [vmem:[#allocation3] sm:$0xff] %v182_v42 }
 0x190   :  { %319 = shalt.err (!%p316_p4)
}
 0x191   :  { %s320_s23 = scalar_lea.hbm %s455_s3, 128 }
 0x192   :  { %p321_p5 = scmp.ne.s32.totalorder %s455_s3, %s320_s23  ;;  %p324_p6 = scmp.lt.u32.totalorder %s320_s23, %s455_s3 }
 0x194   :  { %p326_p7 = pnand %p324_p6, %p321_p5 }
 0x196   :  { %329 = shalt.err (!%p326_p7)
}
 0x197   :  { %193 = dma.vmem_to_hbm [thread:$0]  %s191_s19, 128, %s455_s3, [#allocation4]  }
 0x198   :  { %330 = dma.done.wait [#allocation4], 128  }
 0x199   :  { %331 = vsyncadd [#allocation4], 4294967168 }
 0x19a   :  { %197 = vsyncpa [#allocation4], 1 }

</bundles_post_ra>
